<compile_context>
chip_gen: v7x
topology: tpu7x:2x2x1
jax: 0.10.0
libtpu: 0.0.40
codegen_flags: <defaults>
</compile_context>

<pallas_src>
import jax
import jax.numpy as jnp
from jax import lax
from jax.experimental import pallas as pl
from jax.experimental.pallas import tpu as pltpu

BN_EPS = 1e-5


# ---------------------------------------------------------------------------
# Kernel
# ---------------------------------------------------------------------------
def fc_bn_prelu_kernel(x_ref, wt_ref, gamma_ref, beta_ref, alpha_ref,
                       o_ref, acc_ref):
    """Grid = (N tiles [parallel], K tiles [arbitrary / reduction]).

    x_ref:     (B, tk)  input block                  (matmul dtype)
    wt_ref:    (tk, tn) pre-transposed weight block  (matmul dtype)
    gamma_ref: (1, tn)  BN weight block              (f32)
    beta_ref:  (1, tn)  BN bias block                (f32)
    alpha_ref: (1,)     PReLU shared slope           (SMEM scalar)
    o_ref:     (B, tn)  output block
    acc_ref:   (B, tn)  f32 matmul accumulator scratch
    """
    k = pl.program_id(1)

    @pl.when(k == 0)
    def _():
        acc_ref[...] = jnp.zeros_like(acc_ref)

    # Linear (no bias: training-mode BN mean-subtraction cancels it exactly).
    acc_ref[...] += jnp.dot(x_ref[...], wt_ref[...],
                            preferred_element_type=jnp.float32)

    @pl.when(k == pl.num_programs(1) - 1)
    def _():
        y = acc_ref[...]
        inv_b = 1.0 / y.shape[0]
        mean = jnp.sum(y, axis=0, keepdims=True) * inv_b
        c = y - mean                                            # centered pass:
        var = jnp.sum(c * c, axis=0, keepdims=True) * inv_b     # no E[y^2]-E[y]^2
        scale = gamma_ref[...] * lax.rsqrt(var + BN_EPS)        # biased var, eps=1e-5
        z = c * scale + beta_ref[...]
        a = alpha_ref[0]
        o_ref[...] = jnp.where(z >= 0, z, a * z).astype(o_ref.dtype)
        # TODO(synk): running_mean/running_var updates (needed for eval-mode BN)
        # are not emitted; expose mean/var as extra outputs for a training step.


# ---------------------------------------------------------------------------
# Generation-aware budgets and tile selection
# ---------------------------------------------------------------------------
def _tpu_generation_info():
    """Returns (vmem_capacity_bytes, tensorcores_per_chip) for the local TPU."""
    cap = None
    try:
        cap = int(getattr(pltpu.get_tpu_info(), "vmem_capacity_bytes"))
    except Exception:
        cap = None  # hardware probe only; fall back to device_kind heuristics
    kind = jax.devices()[0].device_kind.lower()
    is_v7 = "v7" in kind
    if cap is None or cap <= 0:
        cap = (64 << 20) if is_v7 else (128 << 20)
    return cap, (2 if is_v7 else 1)


def _vmem_budget(cap_bytes):
    """(tile-selection budget, vmem_limit_bytes) with compiler headroom."""
    if cap_bytes <= (64 << 20):
        # v7x: 64 MiB per TensorCore; leave room for Mosaic internal scratch.
        return 40 << 20, 52 << 20
    # v5e / v6e: 128 MiB physical; the default scoped limit wastes half of it.
    return 100 << 20, 112 << 20


_TN_PREF = (2048, 1792, 1536, 1280, 1024, 896, 768, 640, 512, 384, 256, 128)
_TK_PREF = (2048, 1024, 512, 256, 128)


def _tn_candidates(N, min_n_tiles):
    cands = []
    if N <= 2048 and min_n_tiles <= 1:
        cands.append(N)                       # single full-extent block
    for t in _TN_PREF:
        if t <= N and N % t == 0 and N // t >= min_n_tiles and t not in cands:
            cands.append(t)
    if not cands:
        cands.append(N)                       # awkward N: full extent (correct first)
    cands.sort(reverse=True)
    return cands


def _tk_candidates(K):
    cands = [K]                               # full K (x resident, grid-invariant)
    for t in _TK_PREF:
        if t < K and K % t == 0:
            cands.append(t)
    return cands                              # already descending


def _select_config(B, K, N, itm, out_itm, budget, min_n_tiles):
    def footprint(tn, tk):
        return (2 * itm * B * tk              # x block, double-buffered
                + 2 * itm * tk * tn           # W^T block, double-buffered
                + 2 * out_itm * B * tn        # output block, double-buffered
                + 4 * B * tn                  # f32 accumulator scratch
                + 2 * 4 * B * tn              # f32 BN / PReLU temporaries (headroom)
                + 4 * 4 * tn)                 # gamma / beta blocks

    tn_cands = _tn_candidates(N, min_n_tiles)
    tk_cands = _tk_candidates(K)
    for tn in tn_cands:                       # prefer biggest tn (lane-dense stores,
        for tk in tk_cands:                   # fewest grid steps), then biggest tk
            if footprint(tn, tk) <= budget:
                return tn, tk
    # Last resort: smallest configuration; let the compiler report if it still
    # does not fit rather than failing pre-emptively here.
    return tn_cands[-1], tk_cands[-1]


# ---------------------------------------------------------------------------
# Wrappers
# ---------------------------------------------------------------------------
def prepare_fc_params(w, gamma, beta, alpha, matmul_dtype=jnp.bfloat16):
    """One-time parameter prep — cache the result across forward calls.

    Hoists the weight transpose + cast out of the per-call path: re-creating
    the (K, N) bf16 weight every call costs a full N*K HBM read+write, which
    for small/medium batch rivals the kernel's own weight DMA.
    """
    N, _K = w.shape
    w_t = jnp.asarray(w, dtype=matmul_dtype).T                  # (K, N), lane-dense in N
    gamma2 = jnp.asarray(gamma, jnp.float32).reshape(1, N)
    beta2 = jnp.asarray(beta, jnp.float32).reshape(1, N)
    alpha1 = jnp.asarray(alpha, jnp.float32).reshape(-1)[:1]    # shared PReLU slope
    return w_t, gamma2, beta2, alpha1


def fc_forward_prepared(x, params, *, matmul_dtype=jnp.bfloat16,
                        out_dtype=None, tn=None, tk=None):
    w_t, gamma2, beta2, alpha1 = params
    B, K = x.shape
    K2, N = w_t.shape
    assert K == K2
    out_dtype = jnp.dtype(x.dtype if out_dtype is None else out_dtype)

    itm = jnp.dtype(matmul_dtype).itemsize
    out_itm = out_dtype.itemsize
    cap, num_tc = _tpu_generation_info()
    budget, vmem_limit = _vmem_budget(cap)
    min_n_tiles = num_tc if N >= 256 else 1       # keep both v7x TensorCores busy
    auto_tn, auto_tk = _select_config(B, K, N, itm, out_itm, budget, min_n_tiles)
    tn = auto_tn if tn is None else tn
    tk = auto_tk if tk is None else tk
    assert N % tn == 0 and K % tk == 0
    n_tiles, k_tiles = N // tn, K // tk

    x_mm = jnp.asarray(x, dtype=matmul_dtype)

    cost = pl.CostEstimate(
        flops=2 * B * K * N,
        transcendentals=0,
        bytes_accessed=int(itm * (B * K * (n_tiles if k_tiles > 1 else 1) + K * N)
                           + out_itm * B * N + 4 * (2 * N + 1)),
    )

    return pl.pallas_call(
        fc_bn_prelu_kernel,
        out_shape=jax.ShapeDtypeStruct((B, N), out_dtype),
        grid_spec=pltpu.PrefetchScalarGridSpec(
            num_scalar_prefetch=0,
            grid=(n_tiles, k_tiles),
            in_specs=[
                pl.BlockSpec((B, tk), lambda j, k: (0, k)),          # x block
                pl.BlockSpec((tk, tn), lambda j, k: (k, j)),         # W^T block
                pl.BlockSpec((1, tn), lambda j, k: (0, j)),          # gamma block
                pl.BlockSpec((1, tn), lambda j, k: (0, j)),          # beta block
                pl.BlockSpec(memory_space=pltpu.MemorySpace.SMEM),   # PReLU alpha
            ],
            out_specs=pl.BlockSpec((B, tn), lambda j, k: (0, j)),
            scratch_shapes=[pltpu.VMEM((B, tn), jnp.float32)],
        ),
        compiler_params=pltpu.CompilerParams(
            dimension_semantics=("parallel", "arbitrary"),
            vmem_limit_bytes=int(vmem_limit),
        ),
        cost_estimate=cost,
    )(x_mm, w_t, gamma2, beta2, alpha1)


def fc_forward(x, w, b, gamma, beta, alpha, *, matmul_dtype=jnp.bfloat16,
               out_dtype=None):
    """Fused Linear -> BatchNorm1d(training) -> PReLU forward.

    `b` (the Linear bias) is accepted for parity with nn.Linear but unused:
    training-mode BatchNorm's batch-mean subtraction cancels any per-feature
    constant offset exactly.  For repeated calls, cache prepare_fc_params()
    and call fc_forward_prepared() so the weight transpose is not redone.
    """
    del b  # mathematically a no-op under training-mode BatchNorm
    params = prepare_fc_params(w, gamma, beta, alpha, matmul_dtype=matmul_dtype)
    return fc_forward_prepared(x, params, matmul_dtype=matmul_dtype,
                               out_dtype=out_dtype)


# ---------------------------------------------------------------------------
# Reference & test
# ---------------------------------------------------------------------------
def reference_forward(x, w, b, gamma, beta, alpha, matmul_dtype=jnp.float32):
    xm = x.astype(matmul_dtype)
    wm = w.astype(matmul_dtype)
    y = jnp.dot(xm, wm.T, preferred_element_type=jnp.float32) + b
    mean = jnp.mean(y, axis=0, keepdims=True)
    var = jnp.mean((y - mean) ** 2, axis=0, keepdims=True)
    z = (y - mean) / jnp.sqrt(var + BN_EPS) * gamma + beta
    return jnp.where(z >= 0, z, alpha[0] * z)


def _make_params(key, inplanes, outplanes):
    # Deterministic parameter init matching FC.init_weight():
    #   Linear.weight ~ xavier_normal_, Linear.bias = 0
    #   BatchNorm1d.weight = 1, bias = 0; PReLU weight default = 0.25
    xavier_std = (2.0 / (inplanes + outplanes)) ** 0.5
    w = xavier_std * jax.random.normal(key, (outplanes, inplanes), dtype=jnp.float32)
    b = jnp.zeros((outplanes,), dtype=jnp.float32)
    gamma = jnp.ones((outplanes,), dtype=jnp.float32)
    beta = jnp.zeros((outplanes,), dtype=jnp.float32)
    alpha = jnp.full((1,), 0.25, dtype=jnp.float32)
    return w, b, gamma, beta, alpha


if __name__ == "__main__":
    key = jax.random.PRNGKey(0)
    k_x, k_w, k_x2, k_w2 = jax.random.split(key, 4)

    # ---- Case 1: small shapes, auto tiling (k_tiles == 1 on all generations).
    B, inplanes, outplanes = 8, 32, 256
    w, b, gamma, beta, alpha = _make_params(k_w, inplanes, outplanes)
    x = jax.random.normal(k_x, (B, inplanes), dtype=jnp.float32)

    params = prepare_fc_params(w, gamma, beta, alpha)       # cached weight prep
    out = jax.block_until_ready(fc_forward_prepared(x, params))
    assert out.shape == (B, outplanes)

    ref_mm = reference_forward(x, w, b, gamma, beta, alpha, matmul_dtype=jnp.bfloat16)
    assert jnp.allclose(out, ref_mm, atol=2e-3, rtol=2e-3)
    ref_f32 = reference_forward(x, w, b, gamma, beta, alpha, matmul_dtype=jnp.float32)
    assert jnp.allclose(out, ref_f32, atol=5e-2, rtol=5e-2)

    # ---- Case 2: force the K-tiled accumulator path (grid = (2, 2)).
    B2, inplanes2, outplanes2 = 8, 256, 256
    w2, b2, gamma2, beta2, alpha2 = _make_params(k_w2, inplanes2, outplanes2)
    x2 = jax.random.normal(k_x2, (B2, inplanes2), dtype=jnp.float32)
    params2 = prepare_fc_params(w2, gamma2, beta2, alpha2)
    out2 = jax.block_until_ready(
        fc_forward_prepared(x2, params2, tn=128, tk=128))
    ref2_mm = reference_forward(x2, w2, b2, gamma2, beta2, alpha2,
                                matmul_dtype=jnp.bfloat16)
    assert jnp.allclose(out2, ref2_mm, atol=3e-3, rtol=3e-3)
    ref2_f32 = reference_forward(x2, w2, b2, gamma2, beta2, alpha2,
                                 matmul_dtype=jnp.float32)
    assert jnp.allclose(out2, ref2_f32, atol=5e-2, rtol=5e-2)

    print("KERNEL_OK")
</pallas_src>

<mosaic_0001>
module attributes {stable_mosaic.version = 11 : i64} {
  func.func @fc_bn_prelu_kernel(%arg0: i32, %arg1: i32, %arg2: memref<8x32xbf16, #tpu.memory_space<vmem>>, %arg3: memref<32x256xbf16, #tpu.memory_space<vmem>>, %arg4: memref<1x256xf32, #tpu.memory_space<vmem>>, %arg5: memref<1x256xf32, #tpu.memory_space<vmem>>, %arg6: memref<1xf32, #tpu.memory_space<smem>>, %arg7: memref<8x256xf32, #tpu.memory_space<vmem>>, %arg8: memref<8x256xf32, #tpu.memory_space<vmem>>) attributes {dimension_semantics = [#tpu.dimension_semantics<parallel>, #tpu.dimension_semantics<arbitrary>], iteration_bounds = array<i64: 1, 1>, scalar_prefetch = 0 : i64, scratch_operands = 1 : i64, tpu.core_type = #tpu.core_type<tc>, window_params = [{transform_indices = @transform_0, window_bounds = array<i64: 8, 32>}, {transform_indices = @transform_1, window_bounds = array<i64: 32, 256>}, {transform_indices = @transform_2, window_bounds = array<i64: 1, 256>}, {transform_indices = @transform_3, window_bounds = array<i64: 1, 256>}, {transform_indices = @transform_4, window_bounds = array<i64: 1>}, {transform_indices = @transform_5, window_bounds = array<i64: 8, 256>}]} {
    %c0_i32 = arith.constant 0 : i32
    %0 = arith.cmpi eq, %arg1, %c0_i32 : i32
    %1 = arith.extui %0 : i1 to i32
    %c0_i32_0 = arith.constant 0 : i32
    %2 = arith.cmpi ne, %1, %c0_i32_0 : i32
    scf.if %2 {
      %cst_10 = arith.constant 0.000000e+00 : f32
      %12 = vector.broadcast %cst_10 : f32 to vector<8x256xf32>
      %c0_11 = arith.constant 0 : index
      %c0_12 = arith.constant 0 : index
      %13 = vector.load %arg8[%c0_11, %c0_12] : memref<8x256xf32, #tpu.memory_space<vmem>>, vector<8x256xf32>
      tpu.vector_store %arg8[%c0_11, %c0_12], %12 {strides = array<i32>} : memref<8x256xf32, #tpu.memory_space<vmem>>, vector<8x256xf32>,
    } else {
    }
    %c0 = arith.constant 0 : index
    %c0_1 = arith.constant 0 : index
    %3 = vector.load %arg8[%c0, %c0_1] : memref<8x256xf32, #tpu.memory_space<vmem>>, vector<8x256xf32>
    %c0_2 = arith.constant 0 : index
    %c0_3 = arith.constant 0 : index
    %4 = vector.load %arg2[%c0_2, %c0_3] : memref<8x32xbf16, #tpu.memory_space<vmem>>, vector<8x32xbf16>
    %c0_4 = arith.constant 0 : index
    %c0_5 = arith.constant 0 : index
    %5 = vector.load %arg3[%c0_4, %c0_5] : memref<32x256xbf16, #tpu.memory_space<vmem>>, vector<32x256xbf16>
    %cst = arith.constant dense<0.000000e+00> : vector<8x256xf32>
    %6 = tpu.matmul %4, %5, %cst {dimension_numbers = #tpu.dot_dimension_numbers<[1], [0], [0], [1], [0, 0, 1, 1], [], []>} : vector<8x32xbf16>, vector<32x256xbf16>, vector<8x256xf32> -> vector<8x256xf32>
    %7 = arith.addf %3, %6 : vector<8x256xf32>
    %c0_6 = arith.constant 0 : index
    %c0_7 = arith.constant 0 : index
    %8 = vector.load %arg8[%c0_6, %c0_7] : memref<8x256xf32, #tpu.memory_space<vmem>>, vector<8x256xf32>
    tpu.vector_store %arg8[%c0_6, %c0_7], %7 {strides = array<i32>} : memref<8x256xf32, #tpu.memory_space<vmem>>, vector<8x256xf32>,
    %c0_i32_8 = arith.constant 0 : i32
    %9 = arith.cmpi eq, %arg1, %c0_i32_8 : i32
    %10 = arith.extui %9 : i1 to i32
    %c0_i32_9 = arith.constant 0 : i32
    %11 = arith.cmpi ne, %10, %c0_i32_9 : i32
    scf.if %11 {
      %c0_10 = arith.constant 0 : index
      %c0_11 = arith.constant 0 : index
      %12 = vector.load %arg8[%c0_10, %c0_11] : memref<8x256xf32, #tpu.memory_space<vmem>>, vector<8x256xf32>
      %cst_12 = arith.constant dense<0.000000e+00> : vector<256xf32>
      %13 = vector.multi_reduction <add>, %12, %cst_12 [0] : vector<8x256xf32> to vector<256xf32>
      %14 = vector.shape_cast %13 : vector<256xf32> to vector<1x256xf32>
      %cst_13 = arith.constant 1.250000e-01 : f32
      %15 = vector.broadcast %cst_13 : f32 to vector<1x256xf32>
      %16 = arith.mulf %14, %15 : vector<1x256xf32>
      %17 = vector.broadcast %16 : vector<1x256xf32> to vector<8x256xf32>
      %18 = arith.subf %12, %17 : vector<8x256xf32>
      %19 = arith.mulf %18, %18 : vector<8x256xf32>
      %cst_14 = arith.constant dense<0.000000e+00> : vector<256xf32>
      %20 = vector.multi_reduction <add>, %19, %cst_14 [0] : vector<8x256xf32> to vector<256xf32>
      %21 = vector.shape_cast %20 : vector<256xf32> to vector<1x256xf32>
      %cst_15 = arith.constant 1.250000e-01 : f32
      %22 = vector.broadcast %cst_15 : f32 to vector<1x256xf32>
      %23 = arith.mulf %21, %22 : vector<1x256xf32>
      %c0_16 = arith.constant 0 : index
      %c0_17 = arith.constant 0 : index
      %24 = vector.load %arg4[%c0_16, %c0_17] : memref<1x256xf32, #tpu.memory_space<vmem>>, vector<1x256xf32>
      %cst_18 = arith.constant 9.99999974E-6 : f32
      %25 = vector.broadcast %cst_18 : f32 to vector<1x256xf32>
      %26 = arith.addf %23, %25 : vector<1x256xf32>
      %27 = math.rsqrt %26 : vector<1x256xf32>
      %28 = arith.mulf %24, %27 : vector<1x256xf32>
      %29 = vector.broadcast %28 : vector<1x256xf32> to vector<8x256xf32>
      %30 = arith.mulf %18, %29 : vector<8x256xf32>
      %c0_19 = arith.constant 0 : index
      %c0_20 = arith.constant 0 : index
      %31 = vector.load %arg5[%c0_19, %c0_20] : memref<1x256xf32, #tpu.memory_space<vmem>>, vector<1x256xf32>
      %32 = vector.broadcast %31 : vector<1x256xf32> to vector<8x256xf32>
      %33 = arith.addf %30, %32 : vector<8x256xf32>
      %c0_21 = arith.constant 0 : index
      %34 = memref.load %arg6[%c0_21] : memref<1xf32, #tpu.memory_space<smem>>
      %cst_22 = arith.constant 0.000000e+00 : f32
      %35 = vector.broadcast %cst_22 : f32 to vector<8x256xf32>
      %36 = arith.cmpf oge, %33, %35 : vector<8x256xf32>
      %37 = vector.broadcast %34 : f32 to vector<8x256xf32>
      %38 = arith.mulf %37, %33 : vector<8x256xf32>
      %39 = arith.select %36, %33, %38 : vector<8x256xi1>, vector<8x256xf32>
      %c0_23 = arith.constant 0 : index
      %c0_24 = arith.constant 0 : index
      %40 = vector.load %arg7[%c0_23, %c0_24] : memref<8x256xf32, #tpu.memory_space<vmem>>, vector<8x256xf32>
      tpu.vector_store %arg7[%c0_23, %c0_24], %39 {strides = array<i32>} : memref<8x256xf32, #tpu.memory_space<vmem>>, vector<8x256xf32>,
    } else {
    }
    return
  }
  func.func @transform_0(%arg0: i32, %arg1: i32) -> (i32, i32) {
    %c0_i32 = arith.constant 0 : i32
    %c0_i32_0 = arith.constant 0 : i32
    return %c0_i32, %arg1 : i32, i32
  }
  func.func @transform_1(%arg0: i32, %arg1: i32) -> (i32, i32) {
    %c0_i32 = arith.constant 0 : i32
    return %arg1, %arg0 : i32, i32
  }
  func.func @transform_2(%arg0: i32, %arg1: i32) -> (i32, i32) {
    %c0_i32 = arith.constant 0 : i32
    %c0_i32_0 = arith.constant 0 : i32
    return %c0_i32, %arg0 : i32, i32
  }
  func.func @transform_3(%arg0: i32, %arg1: i32) -> (i32, i32) {
    %c0_i32 = arith.constant 0 : i32
    %c0_i32_0 = arith.constant 0 : i32
    return %c0_i32, %arg0 : i32, i32
  }
  func.func @transform_4(%arg0: i32, %arg1: i32) -> i32 {
    %c0_i32 = arith.constant 0 : i32
    %c0_i32_0 = arith.constant 0 : i32
    return %c0_i32 : i32
  }
  func.func @transform_5(%arg0: i32, %arg1: i32) -> (i32, i32) {
    %c0_i32 = arith.constant 0 : i32
    %c0_i32_0 = arith.constant 0 : i32
    return %c0_i32, %arg0 : i32, i32
  }
}

</mosaic_0001>

<bundles_post_ra>
// kernel: tpu_custom_call.1
= control target key start
LH: loop header
LB: loop body
LE: loop exit
PB: predicated region body
PF: predicated region fallthrough
CT: control target
= control target key end

     0   :  { %11 = vsyncpa [#allocation5], 0  ;;  %s513_s0 = inlined_call_operand.hbm [shape: bf16[8,32], index: 0, kind: input, shape index: {}]   ;;  %s514_s1 = inlined_call_operand.hbm [shape: bf16[32,256], index: 1, kind: input, shape index: {}]   ;;  %s515_s2 = inlined_call_operand.hbm [shape: f32[1,256], index: 2, kind: input, shape index: {}]   ;;  %s516_s3 = inlined_call_operand.hbm [shape: f32[1,256], index: 3, kind: input, shape index: {}]   ;;  %s517_s4 = inlined_call_operand.<no memory space> [shape: f32[1], index: 4, kind: input, shape index: {}]   ;;  %s518_s5 = inlined_call_operand.hbm [shape: f32[8,256], index: 5, kind: output, shape index: {}]  }
   0x1   :  { %12 = vsyncpa [#allocation8], 0 }
   0x2   :  { %13 = vsyncpa [#allocation11], 0 }
   0x3   :  { %14 = vsyncpa [#allocation6], 0  ;;  %s411_s18 = smov [#allocation7]   ;;  %s293_s22 = scalar_lea.hbm %s514_s1, 512 }
   0x4   :  { %s30_s19 = sshll.u32 %s411_s18, 4  ;;  %p294_p0 = scmp.ne.s32.totalorder %s514_s1, %s293_s22  ;;  %s31_s19 = int_to_ptr.vmem [resolvable:$true] %s30_s19 }
   0x5   :  { %p297_p1 = scmp.lt.u32.totalorder %s293_s22, %s514_s1 }
   0x7   :  { %p299_p2 = pnand %p297_p1, %p294_p0 }
   0x9   :  { %302 = shalt.err (!%p299_p2)
}
   0xa   :  { %s303_s27 = scalar_lea.vmem %s31_s19, 512  ;;  %p308_p4 = scmp.lt.s32.totalorder %s31_s19, %s31_s19 }
   0xb   :  { %p304_p3 = scmp.ne.s32.totalorder %s31_s19, %s303_s27  ;;  %p309_p5 = scmp.lt.s32.totalorder %s303_s27, %s303_s27 }
   0xd   :  { %p310_p6 = por %p309_p5, %p308_p4 }
   0xf   :  { %p311_p7 = pnand %p310_p6, %p304_p3 }
  0x11   :  { %314 = shalt.err (!%p311_p7)
}
  0x12   :  { %s412_s28 = smov 128   ;;  %s413_s29 = smov 8  }
  0x13   :  { %36 = dma.hbm_to_vmem [thread:$0]  %s514_s1, 512, %s31_s19, [#allocation8], %s412_s28, %s412_s28, %s413_s29  }
  0x14   :  { %s414_s7 = smov [#allocation4]   ;;  %s415_s9 = smov [#allocation9]  }
  0x15   :  { %s21_s8 = sshll.u32 %s414_s7, 4  ;;  %s43_s10 = sshll.u32 %s415_s9, 4  ;;  %s22_s8 = int_to_ptr.vmem [resolvable:$true] %s21_s8  ;;  %s44_s10 = int_to_ptr.vmem [resolvable:$true] %s43_s10 }
  0x16   :  { %s315_s13 = scalar_lea.hbm %s513_s0, 64 }
  0x17   :  { %p316_p8 = scmp.ne.s32.totalorder %s513_s0, %s315_s13  ;;  %p319_p9 = scmp.lt.u32.totalorder %s315_s13, %s513_s0 }
  0x19   :  { %p321_p10 = pnand %p319_p9, %p316_p8 }
  0x1b   :  { %324 = shalt.err (!%p321_p10)
}
  0x1c   :  { %s325_s1 = scalar_lea.vmem %s22_s8, 64  ;;  %p330_p12 = scmp.lt.s32.totalorder %s22_s8, %s22_s8 }
  0x1d   :  { %p326_p11 = scmp.ne.s32.totalorder %s22_s8, %s325_s1  ;;  %p331_p13 = scmp.lt.s32.totalorder %s325_s1, %s325_s1 }
  0x1f   :  { %p332_p0 = por %p331_p13, %p330_p12 }
  0x21   :  { %p333_p1 = pnand %p332_p0, %p326_p11 }
  0x23   :  { %336 = shalt.err (!%p333_p1)
}
  0x24   :  { %24 = dma.hbm_to_vmem [thread:$0]  %s513_s0, 64, %s22_s8, [#allocation5]  }
  0x25   :  { %s337_s22 = scalar_lea.hbm %s515_s2, 32 }
  0x26   :  { %p338_p2 = scmp.ne.s32.totalorder %s515_s2, %s337_s22  ;;  %p341_p3 = scmp.lt.u32.totalorder %s337_s22, %s515_s2 }
  0x28   :  { %p343_p4 = pnand %p341_p3, %p338_p2 }
  0x2a   :  { %346 = shalt.err (!%p343_p4)
}
  0x2b   :  { %s347_s27 = scalar_lea.vmem %s44_s10, 32  ;;  %p352_p6 = scmp.lt.s32.totalorder %s44_s10, %s44_s10 }
  0x2c   :  { %p348_p5 = scmp.ne.s32.totalorder %s44_s10, %s347_s27  ;;  %p353_p7 = scmp.lt.s32.totalorder %s347_s27, %s347_s27 }
  0x2e   :  { %p354_p8 = por %p353_p7, %p352_p6 }
  0x30   :  { %p355_p9 = pnand %p354_p8, %p348_p5 }
  0x32   :  { %358 = shalt.err (!%p355_p9)
}
  0x33   :  { %46 = dma.hbm_to_vmem [thread:$0]  %s515_s2, 32, %s44_s10, [#allocation8]  }
  0x34   :  { %s416_s29 = smov [#allocation10]   ;;  %s359_s8 = scalar_lea.hbm %s516_s3, 32 }
  0x35   :  { %s53_s30 = sshll.u32 %s416_s29, 4  ;;  %p360_p10 = scmp.ne.s32.totalorder %s516_s3, %s359_s8  ;;  %s54_s30 = int_to_ptr.vmem [resolvable:$true] %s53_s30 }
  0x36   :  { %p363_p11 = scmp.lt.u32.totalorder %s359_s8, %s516_s3 }
  0x38   :  { %p365_p12 = pnand %p363_p11, %p360_p10 }
  0x3a   :  { %368 = shalt.err (!%p365_p12)
}
  0x3b   :  { %s369_s14 = scalar_lea.vmem %s54_s30, 32  ;;  %p374_p0 = scmp.lt.s32.totalorder %s54_s30, %s54_s30 }
  0x3c   :  { %p370_p13 = scmp.ne.s32.totalorder %s54_s30, %s369_s14  ;;  %p375_p1 = scmp.lt.s32.totalorder %s369_s14, %s369_s14 }
  0x3e   :  { %p376_p2 = por %p375_p1, %p374_p0 }
  0x40   :  { %p377_p3 = pnand %p376_p2, %p370_p13 }
  0x42   :  { %380 = shalt.err (!%p377_p3)
}
  0x43   :  { %56 = dma.hbm_to_vmem [thread:$0]  %s516_s3, 32, %s54_s30, [#allocation11]  }
  0x44   :  { %403 = dma.done.wait [#allocation5], 64  }
  0x45   :  { %404 = vsyncadd [#allocation5], 4294967232 }
  0x46   :  { %405 = dma.done.wait [#allocation8], 544  }
  0x47   :  { %406 = vsyncadd [#allocation8], 4294966752 }
  0x48   :  { %407 = dma.done.wait [#allocation11], 32  }
  0x49   :  { %408 = vsyncadd [#allocation11], 4294967264  ;;  %v417_v0 = vmov 0   ;;  %v283_v1 = vld [vmem:[#allocation7 + $0x4] ss:$8 sps:$4 sm:$0xff]   ;;  %vm105_vm0 = vcmask 261120   ;;  %v202_v46 = vlaneseq }
  0x4a   :  { %141 = vmatprep.mubr.bf16.mxu0 %v417_v0  ;;  %v285_v2 = vld [vmem:[#allocation7] ss:$8 sps:$4 sm:$0xff]   ;;  %109 = vmatprep.subr.bf16.mxu0 %v283_v1  ;;  %v286_v3 = vld [vmem:[#allocation7 + $0x14] ss:$8 sps:$4 sm:$0xff]   ;;  %v288_v4 = vld [vmem:[#allocation7 + $0x10] ss:$8 sps:$4 sm:$0xff]  }
  0x4b   :  { %110 = vmatpush1.bf16.msra.mxu0 %v285_v2  ;;  %v80_v5 = vld [vmem:[#allocation4] sm:$0xf]  ;;  %v418_v44 = vmov 1966171168   ;;  %v203_v48 = vshrl.u32 %v202_v46, 7  ;;  %v245_v2 = vstv %s517_s4  ;;  %s419_s16 = smov [#allocation12]  }
  0x4c   :  { %111 = vmatprep.subr.bf16.mxu0 %v286_v3  ;;  %v200_v45 = vunpack.c.l.s4 %v418_v44  ;;  %v191_v54 = vld [vmem:[#allocation9] sm:$0x3]  ;;  %v228_v58 = vld [vmem:[#allocation10] sm:$0x3]  ;;  %s258_s17 = sshll.u32 %s419_s16, 4  ;;  %s259_s17 = int_to_ptr.vmem [resolvable:$true] %s258_s17 }
  0x4d   :  { %v218_v56 = vsub.s32 0, %v203_v48  ;;  %v222_v57 = vsub.s32 1, %v203_v48  ;;  %s381_s1 = scalar_lea.vmem %s259_s17, 256  ;;  %p386_p5 = scmp.lt.s32.totalorder %s259_s17, %s259_s17 }
  0x4e   :  { %v201_v47 = vunpack.c.0.s8 %v200_v45  ;;  %p382_p4 = scmp.ne.s32.totalorder %s259_s17, %s381_s1  ;;  %p387_p6 = scmp.lt.s32.totalorder %s381_s1, %s381_s1 }
  0x4f   :  { %112 = vmatpush1.bf16.msra.mxu0 %v288_v4  ;;  %v237_v62 = vrot.slane %v228_v58, %v222_v57  ;;  %v233_v63 = vrot.slane %v228_v58, %v218_v56 }
  0x50   :  { %v204_v50 = vsub.s32 %v201_v47, %v203_v48  ;;  %p388_p7 = por %p387_p6, %p386_p5 }
  0x52   :  { %273 = vmatmul.mubr.msk.bf16.vlgmr.msra.gmra.mrb[0].mxu0 %vm105_vm0, %v80_v5  ;;  %p389_p8 = pnand %p388_p7, %p382_p4 }
 0x125   :  { %v143_v6 = vpop.f32.mrb[0].mxu0 }
 0x126   :  { %v159_v7 = vrot.slane %v143_v6, 4  ;;  %v145_v8 = vpop.f32.mrb[1].mxu0 }
 0x127   :  { %v165_v9 = vrot.slane %v145_v8, 4  ;;  %v147_v10 = vpop.f32.mrb[2].mxu0 }
 0x128   :  { %v160_v11 = vadd.f32 %v159_v7, %v143_v6  ;;  %v148_v12 = vpop.f32.mrb[3].mxu0 }
 0x129   :  { %v166_v13 = vadd.f32 %v165_v9, %v145_v8 }
 0x12a   :  { %v161_v14 = vrot.slane %v160_v11, 2 }
 0x12b   :  { %v167_v15 = vrot.slane %v166_v13, 2 }
 0x12c   :  { %v162_v16 = vadd.f32 %v161_v14, %v160_v11 }
 0x12d   :  { %v168_v17 = vadd.f32 %v167_v15, %v166_v13 }
 0x12e   :  { %v163_v18 = vrot.slane %v162_v16, 1 }
 0x12f   :  { %v169_v19 = vrot.slane %v168_v17, 1 }
 0x130   :  { %v164_v20 = vadd.f32 %v163_v18, %v162_v16 }
 0x131   :  { %v170_v21 = vadd.f32 %v169_v19, %v168_v17 }
 0x132   :  { %v171_v22 = vmul.f32 0.125, %v164_v20 }
 0x133   :  { %v172_v23 = vmul.f32 0.125, %v170_v21 }
 0x134   :  { %v173_v24 = vsub.f32 %v143_v6, %v171_v22 }
 0x135   :  { %v174_v25 = vsub.f32 %v145_v8, %v172_v23 }
 0x136   :  { %v175_v26 = vmul.f32 %v173_v24, %v173_v24 }
 0x137   :  { %v176_v27 = vmul.f32 %v174_v25, %v174_v25 }
 0x138   :  { %v177_v28 = vrot.slane %v175_v26, 4 }
 0x139   :  { %v183_v29 = vrot.slane %v176_v27, 4 }
 0x13a   :  { %v178_v30 = vadd.f32 %v177_v28, %v175_v26 }
 0x13b   :  { %v184_v31 = vadd.f32 %v183_v29, %v176_v27 }
 0x13c   :  { %v179_v32 = vrot.slane %v178_v30, 2 }
 0x13d   :  { %v185_v33 = vrot.slane %v184_v31, 2 }
 0x13e   :  { %v180_v34 = vadd.f32 %v179_v32, %v178_v30 }
 0x13f   :  { %v186_v35 = vadd.f32 %v185_v33, %v184_v31 }
 0x140   :  { %v181_v36 = vrot.slane %v180_v34, 1 }
 0x141   :  { %v187_v37 = vrot.slane %v186_v35, 1 }
 0x142   :  { %v182_v38 = vadd.f32 %v181_v36, %v180_v34 }
 0x143   :  { %v188_v39 = vadd.f32 %v187_v37, %v186_v35 }
 0x144   :  { %v189_v40 = vmul.f32 0.125, %v182_v38 }
 0x145   :  { %v190_v41 = vmul.f32 0.125, %v188_v39 }
 0x146   :  { %v192_v42 = vadd.f32 1e-05, %v189_v40 }
 0x147   :  { %v193_v43 = vadd.f32 1e-05, %v190_v41 }
 0x148   :  { %289 = vrsqrt.f32 %v192_v42 }
 0x149   :  { %291 = vrsqrt.f32 %v193_v43 }
 0x152   :  { %v290_v49 = vpop.eup %289 }
 0x153   :  { %v292_v51 = vpop.eup %291 }
 0x154   :  { %v198_v52 = vcombine.low %v290_v49, %v292_v51 }
 0x156   :  { %v205_v53 = vrot.slane %v198_v52, %v204_v50 }
 0x158   :  { %v212_v55 = vrot.slane %v205_v53, %v204_v50 }
 0x15a   :  { %v214_v59 = vmul.f32 %v212_v55, %v191_v54 }
 0x15c   :  { %v219_v60 = vrot.slane %v214_v59, %v218_v56  ;;  %v223_v61 = vrot.slane %v214_v59, %v222_v57 }
 0x15e   :  { %v227_v0 = vmul.f32 %v223_v61, %v174_v25  ;;  %v226_v1 = vmul.f32 %v219_v60, %v173_v24 }
 0x160   :  { %v241_v3 = vadd.f32 %v237_v62, %v227_v0  ;;  %v240_v4 = vadd.f32 %v233_v63, %v226_v1 }
 0x162   :  { %vm243_vm1 = vcmp.ge.f32.partialorder %v240_v4, 0.0  ;;  %vm244_vm2 = vcmp.ge.f32.partialorder %v241_v3, 0.0  ;;  %v246_v5 = vmul.f32 %v245_v2, %v240_v4  ;;  %v247_v6 = vmul.f32 %v245_v2, %v241_v3 }
 0x164   :  { %v248_v7 = vsel %vm243_vm1, %v240_v4, %v246_v5  ;;  %v249_v8 = vsel %vm244_vm2, %v241_v3, %v247_v6 }
 0x165   :  { %250 = vst [vmem:[#allocation12] sm:$0xff] %v248_v7  ;;  %251 = vst [vmem:[#allocation12 + $0x8] sm:$0xff] %v249_v8 }
 0x166   :  { %392 = shalt.err (!%p389_p8)
}
 0x167   :  { %s393_s19 = scalar_lea.hbm %s518_s5, 256 }
 0x168   :  { %p394_p9 = scmp.ne.s32.totalorder %s518_s5, %s393_s19  ;;  %p397_p10 = scmp.lt.u32.totalorder %s393_s19, %s518_s5 }
 0x16a   :  { %p399_p11 = pnand %p397_p10, %p394_p9 }
 0x16c   :  { %402 = shalt.err (!%p399_p11)
}
 0x16d   :  { %261 = dma.vmem_to_hbm [thread:$0]  %s259_s17, 256, %s518_s5, [#allocation6]  }
 0x16e   :  { %409 = dma.done.wait [#allocation6], 256  }
 0x16f   :  { %410 = vsyncadd [#allocation6], 4294967040 }
 0x170   :  { %265 = vsyncpa [#allocation5], 1 }
 0x171   :  { %266 = vsyncpa [#allocation8], 1 }
 0x172   :  { %267 = vsyncpa [#allocation11], 1 }
 0x173   :  { %268 = vsyncpa [#allocation6], 1 }

</bundles_post_ra>
